<compile_context>
chip_gen: v5e
topology: v5e:2x2
jax: 0.10.0
libtpu: 0.0.40
codegen_flags: <defaults>
</compile_context>

<pallas_src>
import math

import jax
import jax.numpy as jnp
from jax.experimental import pallas as pl
from jax.experimental.pallas import tpu as pltpu

_GELU_C = math.sqrt(2.0 / math.pi)


def _round_up(a, b):
    return (a + b - 1) // b * b


def _sublane_align(dtype):
    # 8 rows for 4-byte dtypes, 16 for bf16/fp16, 32 for int8.
    return max(8, 32 // jnp.dtype(dtype).itemsize)


def _mlp_kernel(x_ref, w1_ref, b1_ref, w2_ref, b2_ref, o_ref, acc_ref):
    # x_ref: (tm, Cp)   w1_ref: (Cp, th)   b1_ref: (1, th)
    # w2_ref: (th, Cp)  b2_ref: (1, Cp)    o_ref: (tm, Cp)   acc_ref: (tm, Cp) f32
    j = pl.program_id(1)

    @pl.when(j == 0)
    def _():
        acc_ref[...] = jnp.zeros_like(acc_ref)

    # expand: (tm, Cp) @ (Cp, th). Operands stay in their stored dtype (bf16
    # runs the MXU at full rate); accumulation is f32 via preferred_element_type.
    h = jnp.dot(x_ref[...], w1_ref[...], preferred_element_type=jnp.float32)
    h = h + b1_ref[...].astype(jnp.float32)

    # tanh-GELU in the activation dtype: bf16 models use the bf16 VPU/EUP and
    # feed a bf16 operand to the second matmul; f32 models stay f32 (exact).
    g = h.astype(x_ref.dtype)
    g = 0.5 * g * (1.0 + jnp.tanh(_GELU_C * (g + 0.044715 * (g * g * g))))

    # proj slice: (tm, th) @ (th, Cp), accumulated into the f32 scratch.
    acc_ref[...] += jnp.dot(g.astype(w2_ref.dtype), w2_ref[...],
                            preferred_element_type=jnp.float32)

    @pl.when(j == pl.num_programs(1) - 1)
    def _():
        o_ref[...] = (acc_ref[...] + b2_ref[...].astype(jnp.float32)).astype(o_ref.dtype)


def mlp_pallas(x, w1, b1, w2, b2, *, tm=None, th=None):
    """x: (B, T, C). w1: (C, H), b1: (H,), w2: (H, C), b2: (C,) with H = 4*C."""
    B, T, C = x.shape
    H = w1.shape[1]
    M = B * T

    align = _sublane_align(x.dtype)

    # --- padded, lane-dense shapes -------------------------------------------
    Cp = _round_up(C, 128)
    Hp = _round_up(H, 128)

    # row tile: bounded (pipelining / VMEM cap) and >= 2 grid steps when possible
    # so both v7x TensorCores get work on the "parallel" M axis.
    if tm is None:
        m_pad = _round_up(M, align)
        tm = min(256, m_pad)
        if m_pad // tm < 2 and tm >= 2 * align and (tm // 2) % align == 0:
            tm //= 2
    assert tm % align == 0, f"tm={tm} must be a multiple of {align} for {x.dtype}"
    Mp = _round_up(M, tm)

    # hidden tile: stream W1/W2 in chunks when H is large (bounds weight VMEM
    # and the (tm, th) GELU intermediate); keep a single step for small H.
    if th is None:
        if Hp <= 1024:
            th = Hp
        elif Hp % 512 == 0:
            th = 512
        else:
            th = 128
    assert Hp % th == 0 and th % 128 == 0

    # --- pad operands (zero padding is exact: padded rows/cols contribute 0) --
    x2d = x.reshape(M, C)
    if (Mp, Cp) != (M, C):
        x2d = jnp.pad(x2d, ((0, Mp - M), (0, Cp - C)))
    w1p = jnp.pad(w1, ((0, Cp - C), (0, Hp - H))) if (Cp, Hp) != (C, H) else w1
    w2p = jnp.pad(w2, ((0, Hp - H), (0, Cp - C))) if (Hp, Cp) != (H, C) else w2
    b1p = (jnp.pad(b1, (0, Hp - H)) if Hp != H else b1).reshape(1, Hp)
    b2p = (jnp.pad(b2, (0, Cp - C)) if Cp != C else b2).reshape(1, Cp)

    grid = (Mp // tm, Hp // th)

    # --- VMEM budget (double-buffered inputs/outputs + f32 accumulator) -------
    ix, iw = x.dtype.itemsize, w1.dtype.itemsize
    vmem_needed = (
        2 * tm * Cp * ix        # x tiles
        + 2 * Cp * th * iw      # W1 tiles
        + 2 * th * Cp * iw      # W2 tiles
        + 2 * 8 * th * iw       # b1 (sublane-padded)
        + 2 * 8 * Cp * iw       # b2
        + 2 * tm * Cp * ix      # output tiles
        + tm * Cp * 4           # f32 accumulator scratch
        + tm * th * 4           # (tm, th) hidden intermediate
    )
    vmem_limit = max(32 * 1024 * 1024, min(2 * vmem_needed, 96 * 1024 * 1024))

    cost = pl.CostEstimate(
        flops=4 * Mp * Cp * Hp,                     # two matmuls
        transcendentals=Mp * Hp,                    # tanh
        bytes_accessed=(Mp * Cp * ix + Cp * Hp * iw + Hp * Cp * iw
                        + Hp * iw + Cp * iw + Mp * Cp * ix),
    )

    out2d = pl.pallas_call(
        _mlp_kernel,
        out_shape=jax.ShapeDtypeStruct((Mp, Cp), x.dtype),
        grid_spec=pltpu.PrefetchScalarGridSpec(
            num_scalar_prefetch=0,
            grid=grid,
            in_specs=[
                pl.BlockSpec((tm, Cp), lambda i, j: (i, 0)),   # x row tile
                pl.BlockSpec((Cp, th), lambda i, j: (0, j)),   # W1 column slice
                pl.BlockSpec((1, th), lambda i, j: (0, j)),    # b1 slice
                pl.BlockSpec((th, Cp), lambda i, j: (j, 0)),   # W2 row slice
                pl.BlockSpec((1, Cp), lambda i, j: (0, 0)),    # b2
            ],
            out_specs=pl.BlockSpec((tm, Cp), lambda i, j: (i, 0)),
            scratch_shapes=[pltpu.VMEM((tm, Cp), jnp.float32)],
        ),
        compiler_params=pltpu.CompilerParams(
            dimension_semantics=("parallel", "arbitrary"),
            vmem_limit_bytes=int(vmem_limit),
        ),
        cost_estimate=cost,
    )(x2d, w1p, b1p, w2p, b2p)

    return out2d[:M, :C].reshape(B, T, C)


def _reference(x, w1, b1, w2, b2):
    h = jnp.einsum("btc,ch->bth", x, w1) + b1
    h = 0.5 * h * (1.0 + jnp.tanh(_GELU_C * (h + 0.044715 * h ** 3)))
    return jnp.einsum("bth,hc->btc", h, w2) + b2


if __name__ == "__main__":
    # config: n_embd=32, bias=True; batch=2, seq=8
    B, T, C = 2, 8, 32
    H = 4 * C

    key = jax.random.PRNGKey(0)
    kx, k1, k2, k3, k4 = jax.random.split(key, 5)

    x = jax.random.normal(kx, (B, T, C), dtype=jnp.float32)

    # deterministic init mimicking nn.Linear's U(-1/sqrt(fan_in), 1/sqrt(fan_in))
    bound1 = 1.0 / math.sqrt(C)
    bound2 = 1.0 / math.sqrt(H)
    # stored as (in, out) so the kernel computes x @ W (== x @ W_torch.T)
    w1 = jax.random.uniform(k1, (C, H), jnp.float32, -bound1, bound1)
    b1 = jax.random.uniform(k2, (H,), jnp.float32, -bound1, bound1)
    w2 = jax.random.uniform(k3, (H, C), jnp.float32, -bound2, bound2)
    b2 = jax.random.uniform(k4, (C,), jnp.float32, -bound2, bound2)

    out = mlp_pallas(x, w1, b1, w2, b2)
    out = jax.block_until_ready(out)

    ref = _reference(x, w1, b1, w2, b2)
    assert out.shape == (B, T, C)
    assert jnp.allclose(out, ref, atol=1e-5, rtol=1e-5)

    print("KERNEL_OK")
</pallas_src>

<mosaic_0001>
module attributes {stable_mosaic.version = 11 : i64} {
  func.func @_mlp_kernel(%arg0: i32, %arg1: i32, %arg2: memref<8x128xf32, #tpu.memory_space<vmem>>, %arg3: memref<128x128xf32, #tpu.memory_space<vmem>>, %arg4: memref<1x128xf32, #tpu.memory_space<vmem>>, %arg5: memref<128x128xf32, #tpu.memory_space<vmem>>, %arg6: memref<1x128xf32, #tpu.memory_space<vmem>>, %arg7: memref<8x128xf32, #tpu.memory_space<vmem>>, %arg8: memref<8x128xf32, #tpu.memory_space<vmem>>) attributes {dimension_semantics = [#tpu.dimension_semantics<parallel>, #tpu.dimension_semantics<arbitrary>], iteration_bounds = array<i64: 2, 1>, scalar_prefetch = 0 : i64, scratch_operands = 1 : i64, tpu.core_type = #tpu.core_type<tc>, window_params = [{transform_indices = @transform_0, window_bounds = array<i64: 8, 128>}, {transform_indices = @transform_1, window_bounds = array<i64: 128, 128>}, {transform_indices = @transform_2, window_bounds = array<i64: 1, 128>}, {transform_indices = @transform_3, window_bounds = array<i64: 128, 128>}, {pipeline_mode = #tpu.pipeline_mode<synchronous>, transform_indices = @transform_4, window_bounds = array<i64: 1, 128>}, {transform_indices = @transform_5, window_bounds = array<i64: 8, 128>}]} {
    %c0_i32 = arith.constant 0 : i32
    %0 = arith.cmpi eq, %arg1, %c0_i32 : i32
    %1 = arith.extui %0 : i1 to i32
    %c0_i32_0 = arith.constant 0 : i32
    %2 = arith.cmpi ne, %1, %c0_i32_0 : i32
    scf.if %2 {
      %cst_19 = arith.constant 0.000000e+00 : f32
      %30 = vector.broadcast %cst_19 : f32 to vector<8x128xf32>
      %c0_20 = arith.constant 0 : index
      %c0_21 = arith.constant 0 : index
      %31 = vector.load %arg8[%c0_20, %c0_21] : memref<8x128xf32, #tpu.memory_space<vmem>>, vector<8x128xf32>
      tpu.vector_store %arg8[%c0_20, %c0_21], %30 {strides = array<i32>} : memref<8x128xf32, #tpu.memory_space<vmem>>, vector<8x128xf32>,
    } else {
    }
    %c0 = arith.constant 0 : index
    %c0_1 = arith.constant 0 : index
    %3 = vector.load %arg2[%c0, %c0_1] : memref<8x128xf32, #tpu.memory_space<vmem>>, vector<8x128xf32>
    %c0_2 = arith.constant 0 : index
    %c0_3 = arith.constant 0 : index
    %4 = vector.load %arg3[%c0_2, %c0_3] : memref<128x128xf32, #tpu.memory_space<vmem>>, vector<128x128xf32>
    %cst = arith.constant dense<0.000000e+00> : vector<8x128xf32>
    %5 = tpu.matmul %3, %4, %cst {dimension_numbers = #tpu.dot_dimension_numbers<[1], [0], [0], [1], [0, 0, 1, 1], [], []>} : vector<8x128xf32>, vector<128x128xf32>, vector<8x128xf32> -> vector<8x128xf32>
    %c0_4 = arith.constant 0 : index
    %c0_5 = arith.constant 0 : index
    %6 = vector.load %arg4[%c0_4, %c0_5] : memref<1x128xf32, #tpu.memory_space<vmem>>, vector<1x128xf32>
    %7 = vector.broadcast %6 : vector<1x128xf32> to vector<8x128xf32>
    %8 = arith.addf %5, %7 : vector<8x128xf32>
    %cst_6 = arith.constant 5.000000e-01 : f32
    %9 = vector.broadcast %cst_6 : f32 to vector<8x128xf32>
    %10 = arith.mulf %9, %8 : vector<8x128xf32>
    %11 = arith.mulf %8, %8 : vector<8x128xf32>
    %12 = arith.mulf %11, %8 : vector<8x128xf32>
    %cst_7 = arith.constant 4.471500e-02 : f32
    %13 = vector.broadcast %cst_7 : f32 to vector<8x128xf32>
    %14 = arith.mulf %13, %12 : vector<8x128xf32>
    %15 = arith.addf %8, %14 : vector<8x128xf32>
    %cst_8 = arith.constant 0.797884583 : f32
    %16 = vector.broadcast %cst_8 : f32 to vector<8x128xf32>
    %17 = arith.mulf %16, %15 : vector<8x128xf32>
    %18 = math.tanh %17 : vector<8x128xf32>
    %cst_9 = arith.constant 1.000000e+00 : f32
    %19 = vector.broadcast %cst_9 : f32 to vector<8x128xf32>
    %20 = arith.addf %19, %18 : vector<8x128xf32>
    %21 = arith.mulf %10, %20 : vector<8x128xf32>
    %c0_10 = arith.constant 0 : index
    %c0_11 = arith.constant 0 : index
    %22 = vector.load %arg8[%c0_10, %c0_11] : memref<8x128xf32, #tpu.memory_space<vmem>>, vector<8x128xf32>
    %c0_12 = arith.constant 0 : index
    %c0_13 = arith.constant 0 : index
    %23 = vector.load %arg5[%c0_12, %c0_13] : memref<128x128xf32, #tpu.memory_space<vmem>>, vector<128x128xf32>
    %cst_14 = arith.constant dense<0.000000e+00> : vector<8x128xf32>
    %24 = tpu.matmul %21, %23, %cst_14 {dimension_numbers = #tpu.dot_dimension_numbers<[1], [0], [0], [1], [0, 0, 1, 1], [], []>} : vector<8x128xf32>, vector<128x128xf32>, vector<8x128xf32> -> vector<8x128xf32>
    %25 = arith.addf %22, %24 : vector<8x128xf32>
    %c0_15 = arith.constant 0 : index
    %c0_16 = arith.constant 0 : index
    %26 = vector.load %arg8[%c0_15, %c0_16] : memref<8x128xf32, #tpu.memory_space<vmem>>, vector<8x128xf32>
    tpu.vector_store %arg8[%c0_15, %c0_16], %25 {strides = array<i32>} : memref<8x128xf32, #tpu.memory_space<vmem>>, vector<8x128xf32>,
    %c0_i32_17 = arith.constant 0 : i32
    %27 = arith.cmpi eq, %arg1, %c0_i32_17 : i32
    %28 = arith.extui %27 : i1 to i32
    %c0_i32_18 = arith.constant 0 : i32
    %29 = arith.cmpi ne, %28, %c0_i32_18 : i32
    scf.if %29 {
      %c0_19 = arith.constant 0 : index
      %c0_20 = arith.constant 0 : index
      %30 = vector.load %arg8[%c0_19, %c0_20] : memref<8x128xf32, #tpu.memory_space<vmem>>, vector<8x128xf32>
      %c0_21 = arith.constant 0 : index
      %c0_22 = arith.constant 0 : index
      %31 = vector.load %arg6[%c0_21, %c0_22] : memref<1x128xf32, #tpu.memory_space<vmem>>, vector<1x128xf32>
      %32 = vector.broadcast %31 : vector<1x128xf32> to vector<8x128xf32>
      %33 = arith.addf %30, %32 : vector<8x128xf32>
      %c0_23 = arith.constant 0 : index
      %c0_24 = arith.constant 0 : index
      %34 = vector.load %arg7[%c0_23, %c0_24] : memref<8x128xf32, #tpu.memory_space<vmem>>, vector<8x128xf32>
      tpu.vector_store %arg7[%c0_23, %c0_24], %33 {strides = array<i32>} : memref<8x128xf32, #tpu.memory_space<vmem>>, vector<8x128xf32>,
    } else {
    }
    return
  }
  func.func @transform_0(%arg0: i32, %arg1: i32) -> (i32, i32) {
    %c0_i32 = arith.constant 0 : i32
    %c0_i32_0 = arith.constant 0 : i32
    return %arg0, %c0_i32 : i32, i32
  }
  func.func @transform_1(%arg0: i32, %arg1: i32) -> (i32, i32) {
    %c0_i32 = arith.constant 0 : i32
    %c0_i32_0 = arith.constant 0 : i32
    return %c0_i32, %arg1 : i32, i32
  }
  func.func @transform_2(%arg0: i32, %arg1: i32) -> (i32, i32) {
    %c0_i32 = arith.constant 0 : i32
    %c0_i32_0 = arith.constant 0 : i32
    return %c0_i32, %arg1 : i32, i32
  }
  func.func @transform_3(%arg0: i32, %arg1: i32) -> (i32, i32) {
    %c0_i32 = arith.constant 0 : i32
    %c0_i32_0 = arith.constant 0 : i32
    return %arg1, %c0_i32 : i32, i32
  }
  func.func @transform_4(%arg0: i32, %arg1: i32) -> (i32, i32) {
    %c0_i32 = arith.constant 0 : i32
    %c0_i32_0 = arith.constant 0 : i32
    %c0_i32_1 = arith.constant 0 : i32
    return %c0_i32, %c0_i32_0 : i32, i32
  }
  func.func @transform_5(%arg0: i32, %arg1: i32) -> (i32, i32) {
    %c0_i32 = arith.constant 0 : i32
    %c0_i32_0 = arith.constant 0 : i32
    return %arg0, %c0_i32 : i32, i32
  }
}

</mosaic_0001>

<bundles_post_ra>
// kernel: tpu_custom_call.1
= control target key start
LH: loop header
LB: loop body
LE: loop exit
PB: predicated region body
PF: predicated region fallthrough
CT: control target
= control target key end

     0   :  { %10 = vsyncpa [#allocation4], 0  ;;  %s1026_s0 = inlined_call_operand.hbm [shape: f32[16,128], index: 0, kind: input, shape index: {}]   ;;  %s1027_s1 = inlined_call_operand.hbm [shape: f32[128,128], index: 1, kind: input, shape index: {}]   ;;  %s1028_s2 = inlined_call_operand.vmem [shape: f32[1,128], index: 2, kind: input, shape index: {}]   ;;  %s1029_s3 = inlined_call_operand.hbm [shape: f32[128,128], index: 3, kind: input, shape index: {}]   ;;  %s1030_s4 = inlined_call_operand.vmem [shape: f32[1,128], index: 4, kind: input, shape index: {}]   ;;  %s1031_s5 = inlined_call_operand.hbm [shape: f32[16,128], index: 5, kind: output, shape index: {}]  }
   0x1   :  { %12 = vsyncpa [#allocation4 + $0x1], 0 }
   0x2   :  { %13 = vsyncpa [#allocation7], 0 }
   0x3   :  { %14 = vsyncpa [#allocation5], 0 }
   0x4   :  { %16 = vsyncpa [#allocation5 + $0x1], 0  ;;  %s869_s18 = smov 0   ;;  %s871_s19 = smov 0  }
   0x5   :  { %s873_s20 = smov 0   ;;  %s875_s21 = smov 0  }
   0x6   :  { %s877_s22 = smov 0   ;;  %s879_s23 = smov 0  }
   0x7 LB: > { %s550_s24 = sadd.s32 4294967295, %s833_s23   ;;  %p552_p0 = scmp.ge.s32.totalorder %s833_s23, 1  ;;  %s833_s23 = sphi %s879_s23, %s22_s23   ;;  %s829_s22 = sphi %s877_s22, %s1041_s22   ;;  %s825_s21 = sphi %s875_s21, %s1040_s21   ;;  %s821_s20 = sphi %s873_s20, %s1039_s20   ;;  %s817_s19 = sphi %s871_s19, %s1038_s19   ;;  %s813_s18 = sphi %s869_s18, %s1037_s18  }
   0x8   : > { %p903_p1 = scmp.eq.s32.totalorder %s550_s24, 0  ;;  %p190_p2 = scmp.lt.s32.totalorder %s833_s23, 3 }
   0x9   : > { %s203_s28 = sshll.u32 %s1027_s1, 4  ;;  %s835_s30 = smov [#allocation6]   ;;  %s204_s28 = int_to_ptr.hbm [resolvable:$true] %s203_s28 }
   0xa   : > { %p911_p3 = pnand %p552_p0, %p190_p2  ;;  %s205_s6 = sshll.u32 %s835_s30, 4  ;;  %s206_s6 = int_to_ptr.vmem [resolvable:$true] %s205_s6 }
   0xb   : > { %p556_p6 = scmp.ge.s32.totalorder %s833_s23, 2  ;;  %s226_s9 = sshll.u32 %s1029_s3, 4  ;;  %s227_s9 = int_to_ptr.hbm [resolvable:$true] %s226_s9 }
   0xc   : > { %p580_p4 = pneg %p911_p3  ;;  %s836_s10 = smov 128  }
   0xd   : > { %s837_s11 = smov 8   ;;  %s838_s12 = smov [#allocation8]  }
   0xe   : > { %p581_p5 = pnand %p580_p4, %p903_p1  ;;  %s228_s13 = sshll.u32 %s838_s12, 4  ;;  %s229_s13 = int_to_ptr.vmem [resolvable:$true] %s228_s13 }
   0xf   : > { %s34_s14 = sadd.s32 1, %s829_s22  ;;  %s551_s15 = sadd.s32 4294967294, %s833_s23  }
  0x10   : > { %583 = dma.hbm_to_vmem [thread:$0]  (!%p581_p5), %s204_s28, 2048, %s206_s6, [#allocation7], %s836_s10, %s836_s10, %s837_s11  }
  0x11   : > { %586 = dma.hbm_to_vmem [thread:$0]  (!%p581_p5), %s227_s9, 2048, %s229_s13, [#allocation7], %s836_s10, %s836_s10, %s837_s11  }
  0x12   : > { %p36_p7 = scmp.ge.s32.totalorder %s34_s14, 2  ;;  %s41_s16 = sadd.s32 1, %s821_s20 }
  0x13   : > { %p48_p8 = scmp.ne.s32.totalorder %s821_s20, %s817_s19  ;;  %p49_p9 = scmp.eq.s32.totalorder %s833_s23, 0 }
  0x14   : > { %s1043_s14 = smov (%p36_p7, %s34_s14), 0  ;;  %p54_p10 = scmp.ne.s32.totalorder %s817_s19, %s813_s18 }
  0x15   : > { %s38_s17 = ssub.s32 %s829_s22, %s1043_s14  ;;  %p177_p11 = scmp.eq.s32.totalorder %s550_s24, 1 }
  0x16   : > { %p39_p12 = scmp.eq.s32.totalorder %s38_s17, 0  ;;  %p939_p13 = por %p903_p1, %p54_p10 }
  0x17   : > { %p943_p0 = por %p177_p11, %p48_p8  ;;  %p183_p2 = scmp.eq.s32.totalorder %s551_s15, 1 }
  0x18   : > { %s948_s28 = scalar_select %p39_p12, %s821_s20, %s41_s16  }
  0x19   : > { %p50_p4 = por %p49_p9, %p48_p8  ;;  %p950_p5 = por %p183_p2, %p54_p10 }
  0x1a   : > { %s245_s6 = sand.u32 1, %s821_s20   ;;  %s558_s24 = sshll.u32 %s829_s22, 3 }
  0x1b   : > { %p597_p7 = scmp.lt.s32.totalorder %s833_s23, 2  ;;  %s557_s7 = sshll.u32 %s245_s6, 3 }
  0x1c   : > { %s253_s10 = scalar_lea.hbm %s1026_s0, %s558_s24  ;;  %s249_s12 = scalar_lea.vmem [#allocation3], %s557_s7 }
  0x1d   : > { %s255_s11 = sshll.u32 %s253_s10, 4  ;;  %s257_s13 = sshll.u32 %s249_s12, 4  ;;  %s256_s11 = int_to_ptr.hbm [resolvable:$true] %s255_s11  ;;  %s258_s13 = int_to_ptr.vmem [resolvable:$true] %s257_s13 }
  0x1e   : > { %p588_p11 = pnand %p597_p7, %p50_p4  ;;  %s246_s15 = scalar_lea.sflag [#allocation4], %s245_s6 }
  0x1f   : > { %266 = sbr.rel (%p911_p3) target bundleno = 351 (0x15f), region = 40  ;;  %s963_s16 = sand.u32 (!%p911_p3), 1, %s817_s19  }
  0x20   : > { %590 = dma.hbm_to_vmem [thread:$0]  (!%p588_p11), %s256_s11, 128, %s258_s13, %s246_s15  }
  0x21   : > { %s560_s17 = sshll.u32 (!%p911_p3), %s963_s16, 3  ;;  %s269_s24 = scalar_lea.sflag (!%p911_p3), [#allocation4], %s963_s16 }
  0x22   : > { %s969_s7 = scalar_lea.vmem (!%p911_p3), [#allocation3], %s560_s17 }
  0x24   : > { %800 = dma.done.wait (%p939_p13), %s269_s24, 128  }
  0x25   : > { %802 = vsyncadd (%p939_p13), %s269_s24, 4294967168 }
  0x26   : > { %804 = dma.done.wait (%p903_p1), [#allocation7], 4096  }
  0x27   : > { %806 = vsyncadd (%p903_p1), [#allocation7], 4294963200  ;;  %v338_v0 = vld [vmem:[#allocation6 + $0x78] sm:$0xff]  ;;  %v337_v1 = vld [vmem:[#allocation6 + $0x70] sm:$0xff]  ;;  %s565_s26 = sshll.u32 %s825_s21, 3  ;;  %s312_s12 = scalar_lea.vmem [#allocation9], %s560_s17 }
  0x28   : > { %343 = vmatpush.msra.mxu0 %v338_v0  ;;  %v336_v2 = vld [vmem:[#allocation6 + $0x68] sm:$0xff]  ;;  %v335_v3 = vld [vmem:[#allocation6 + $0x60] sm:$0xff]  ;;  %v388_v4 = vld [vmem:[#allocation8 + $0x78] sm:$0xff]  ;;  %s432_s9 = scalar_lea.hbm %s1031_s5, %s565_s26  ;;  %s434_s13 = sshll.u32 %s312_s12, 4  ;;  %s435_s13 = int_to_ptr.vmem [resolvable:$true] %s434_s13 }
  0x29   : > { %v334_v5 = vld [vmem:[#allocation6 + $0x58] sm:$0xff]  ;;  %389 = vmatpush.msra.mxu1 %v388_v4  ;;  %v387_v6 = vld [vmem:[#allocation8 + $0x70] sm:$0xff]  ;;  %v386_v7 = vld [vmem:[#allocation8 + $0x68] sm:$0xff]  ;;  %s436_s15 = sshll.u32 %s432_s9, 4  ;;  %s422_s24 = scalar_lea.sflag [#allocation5], %s963_s16  ;;  %s437_s15 = int_to_ptr.hbm [resolvable:$true] %s436_s15 }
  0x2a   : > { %344 = vmatpush.msra.mxu0 %v337_v1  ;;  %v333_v8 = vld [vmem:[#allocation6 + $0x50] sm:$0xff]  ;;  %v385_v9 = vld [vmem:[#allocation8 + $0x60] sm:$0xff]  ;;  %v332_v10 = vld [vmem:[#allocation6 + $0x48] sm:$0xff]  ;;  %s761_s21 = sshra.s32 %s437_s15, 4  ;;  %s767_s26 = scalar_lea.hbm %s1031_s5, 16  ;;  %s762_s21 = int_to_ptr.hbm [resolvable:$true] %s761_s21 }
  0x2b   : > { %390 = vmatpush.msra.mxu1 %v387_v6  ;;  %v331_v11 = vld [vmem:[#allocation6 + $0x40] sm:$0xff]  ;;  %v330_v12 = vld [vmem:[#allocation6 + $0x38] sm:$0xff]  ;;  %v329_v13 = vld [vmem:[#allocation6 + $0x30] sm:$0xff]  ;;  %p768_p9 = scmp.lt.s32.totalorder %s762_s21, %s1031_s5 }
  0x2c   : > { %345 = vmatpush.msra.mxu0 %v336_v2  ;;  %v328_v14 = vld [vmem:[#allocation6 + $0x28] sm:$0xff]  ;;  %v327_v15 = vld [vmem:[#allocation6 + $0x20] sm:$0xff]  ;;  %v326_v16 = vld [vmem:[#allocation6 + $0x18] sm:$0xff] }
  0x2d   : > { %391 = vmatpush.msra.mxu1 %v386_v7  ;;  %v325_v17 = vld [vmem:[#allocation6 + $0x10] sm:$0xff]  ;;  %v324_v18 = vld [vmem:[#allocation6 + $0x8] sm:$0xff]  ;;  %v323_v19 = vld [vmem:[#allocation6] sm:$0xff] }
  0x2e   : > { %346 = vmatpush.msra.mxu0 %v335_v3  ;;  %v322_v20 = vld [vmem:[%s969_s7] sm:$0xff]  ;;  %v382_v23 = vld [vmem:[#allocation8 + $0x48] sm:$0xff]  ;;  %v381_v24 = vld [vmem:[#allocation8 + $0x40] sm:$0xff]  ;;  %s763_s7 = scalar_lea.hbm %s762_s21, 8 }
  0x2f   : > { %392 = vmatpush.msra.mxu1 %v385_v9  ;;  %v384_v21 = vld [vmem:[#allocation8 + $0x58] sm:$0xff]  ;;  %v383_v22 = vld [vmem:[#allocation8 + $0x50] sm:$0xff]  ;;  %v378_v27 = vld [vmem:[#allocation8 + $0x28] sm:$0xff]  ;;  %p764_p1 = scmp.ne.s32.totalorder %s762_s21, %s763_s7  ;;  %p769_p10 = scmp.lt.s32.totalorder %s767_s26, %s763_s7 }
  0x30   : > { %347 = vmatpush.msra.mxu0 %v334_v5  ;;  %v380_v25 = vld [vmem:[#allocation8 + $0x38] sm:$0xff]  ;;  %v379_v26 = vld [vmem:[#allocation8 + $0x30] sm:$0xff]  ;;  %v377_v28 = vld [vmem:[#allocation8 + $0x20] sm:$0xff] }
  0x31   : > { %393 = vmatpush.msra.mxu1 %v384_v21  ;;  %v376_v29 = vld [vmem:[#allocation8 + $0x18] sm:$0xff]  ;;  %v375_v30 = vld [vmem:[#allocation8 + $0x10] sm:$0xff]  ;;  %v374_v31 = vld [vmem:[#allocation8 + $0x8] sm:$0xff]  ;;  %p765_p3 = pnand %p764_p1, %p943_p0  ;;  %p770_p12 = por %p769_p10, %p768_p9 }
  0x32   : > { %348 = vmatpush.msra.mxu0 %v333_v8  ;;  %v373_v32 = vld [vmem:[#allocation8] sm:$0xff]  ;;  %v653_v33 = vld [vmem:[%s1028_s2] ss:$0 sm:$0xff] }
  0x33   : > { %394 = vmatpush.msra.mxu1 %v383_v22  ;;  %v654_v45 = vld [vmem:[%s1030_s4] ss:$0 sm:$0xff]  ;;  %p766_p8 = pneg %p765_p3 }
  0x34   : > { %349 = vmatpush.msra.mxu0 %v332_v10 }
  0x35   : > { %395 = vmatpush.msra.mxu1 %v382_v23  ;;  %p771_p13 = pnand %p770_p12, %p766_p8 }
  0x36   : > { %350 = vmatpush.msra.mxu0 %v331_v11 }
  0x37   : > { %396 = vmatpush.msra.mxu1 %v381_v24 }
  0x38   : > { %351 = vmatpush.msra.mxu0 %v330_v12 }
  0x39   : > { %397 = vmatpush.msra.mxu1 %v380_v25 }
  0x3a   : > { %352 = vmatpush.msra.mxu0 %v329_v13 }
  0x3b   : > { %398 = vmatpush.msra.mxu1 %v379_v26 }
  0x3c   : > { %353 = vmatpush.msra.mxu0 %v328_v14 }
  0x3d   : > { %399 = vmatpush.msra.mxu1 %v378_v27 }
  0x3e   : > { %354 = vmatpush.msra.mxu0 %v327_v15 }
  0x3f   : > { %400 = vmatpush.msra.mxu1 %v377_v28 }
  0x40   : > { %355 = vmatpush.msra.mxu0 %v326_v16 }
  0x41   : > { %401 = vmatpush.msra.mxu1 %v376_v29 }
  0x42   : > { %356 = vmatpush.msra.mxu0 %v325_v17 }
  0x43   : > { %402 = vmatpush.msra.mxu1 %v375_v30 }
  0x44   : > { %357 = vmatpush.msra.mxu0 %v324_v18 }
  0x45   : > { %403 = vmatpush.msra.mxu1 %v374_v31 }
  0x46   : > { %358 = vmatpush.msra.mxu0 %v323_v19 }
  0x47   : > { %359 = vmatmul.f32.vlgmr.msra.gmra.mxu0 %v322_v20  ;;  %404 = vmatpush.msra.mxu1 %v373_v32 }
  0xc4   : > { %v360_v34 = vpop.f32.mrf.mxu0 }
  0xc5   : > { %v361_v35 = vadd.f32 %v653_v33, %v360_v34 }
  0xc7   : > { %v364_v36 = vmul.f32 %v361_v35, %v361_v35  ;;  %v363_v42 = vmul.f32 0.5, %v361_v35 }
  0xc9   : > { %v365_v37 = vmul.f32 %v364_v36, %v361_v35 }
  0xcb   : > { %v366_v38 = vmul.f32 0.044715, %v365_v37 }
  0xcd   : > { %v367_v39 = vadd.f32 %v366_v38, %v361_v35 }
  0xcf   : > { %v368_v40 = vmul.f32 0.7978846, %v367_v39 }
  0xd1   : > { %655 = vtanh.f32 %v368_v40 }
  0xd7   : > { %v656_v41 = vpop.eup %655 }
  0xd8   : > { %v370_v43 = vadd.f32 1.0, %v656_v41 }
  0xda   : > { %v371_v44 = vmul.f32 %v370_v43, %v363_v42 }
  0xdc   : > { %405 = vmatmul.f32.vlgmr.msra.gmra.mxu1 %v371_v44 }
 0x159   : > { %v406_v46 = vpop.f32.mrf.mxu1 }
 0x15a   : > { %v419_v47 = vadd.f32 %v654_v45, %v406_v46 }
 0x15c   : > { %420 = vst [vmem:[%s312_s12] sm:$0xff] %v419_v47 }
 0x15d   : > { %774 = shalt.err (!%p771_p13)
}
 0x15e   : > { %578 = dma.vmem_to_hbm [thread:$0]  (%p943_p0), %s435_s13, 128, %s437_s15, %s422_s24  }
 0x15f PF: > { %s448_s16 = sand.u32 1, %s813_s18   ;;  %p592_p2 = pnand %p556_p6, %p950_p5 }
 0x160   : > { %s449_s8 = scalar_lea.sflag [#allocation5], %s448_s16 }
 0x161   : > { %p593_p4 = pneg %p592_p2 }
 0x163   : > { %808 = dma.done.wait (%p593_p4), %s449_s8, 128  }
 0x164   : > { %810 = vsyncadd (%p593_p4), %s449_s8, 4294967168  ;;  %s22_s23 = sadd.s32 1, %s833_s23   ;;  %s1037_s18 = smov %s817_s19 }
 0x165   : > { %p19_p7 = scmp.ge.s32.totalorder %s22_s23, 4   ;;  %s1038_s19 = smov %s821_s20 }
 0x166   : > { %s1039_s20 = smov %s948_s28  ;;  %s1040_s21 = smov %s829_s22 }
 0x167   : > { %s1041_s22 = smov %s1043_s14  ;;  %21 = sbr.rel (!%p19_p7) target bundleno = 7 (0x7), region = 106 }
 0x16c   :  { %455 = vsyncpa [#allocation4], 1 }
 0x16d   :  { %457 = vsyncpa [#allocation4 + $0x1], 1 }
 0x16e   :  { %458 = vsyncpa [#allocation7], 1 }
 0x16f   :  { %459 = vsyncpa [#allocation5], 1 }
 0x170   :  { %461 = vsyncpa [#allocation5 + $0x1], 1 }

</bundles_post_ra>
